<compile_context>
chip_gen: v7x
topology: tpu7x:2x2x1
jax: 0.10.0
libtpu: 0.0.40
codegen_flags: <defaults>
</compile_context>

<pallas_src>
import functools

import jax
import jax.numpy as jnp
from jax.experimental import pallas as pl
from jax.experimental.pallas import tpu as pltpu


def _dwconv_bn_kernel(x_ref, w_ref, b_ref, o_ref, *, H, W, KH, KW):
    """Depthwise KHxKW conv (+ folded BN) on the whole (N*C, H*W) slab.

    x_ref: (NC, HW)      input, channels*batch on sublanes, H*W on lanes
    w_ref: (NC, KH*KW)   depthwise weights with BN scale pre-folded
    b_ref: (NC, 1)       folded BN bias
    o_ref: (NC, HW)      output
    """
    NC, HW = o_ref.shape

    x = x_ref[...].astype(jnp.float32)
    w = w_ref[...]            # hoisted: one load, sliced in-register below
    b = b_ref[...]

    # Per-lane row/column indices of the flattened spatial axis, computed once.
    idx = jax.lax.broadcasted_iota(jnp.int32, (NC, HW), 1)
    if (W & (W - 1)) == 0:                       # power of two -> bit ops
        col = idx & (W - 1)
        row = idx >> (W.bit_length() - 1)
    else:
        col = idx % W
        row = idx // W

    # Vertical taps: lane roll by +/-W within the flattened axis.  Lanes that
    # wrapped across the top/bottom image boundary are zeroed (conv padding).
    slabs = {}
    for dh in range(-(KH // 2), KH // 2 + 1):
        if dh == 0:
            slabs[dh] = x
        else:
            shifted = pltpu.roll(x, (-dh * W) % HW, axis=1)
            if dh < 0:
                slabs[dh] = jnp.where(row >= -dh, shifted, 0.0)
            else:
                slabs[dh] = jnp.where(row < H - dh, shifted, 0.0)

    # Horizontal taps: sum the vertical taps per column-offset first (the
    # per-channel weights are lane-constant, so the roll commutes), then one
    # roll + one column mask per non-center offset.
    acc = jnp.zeros((NC, HW), jnp.float32)
    for dw in range(-(KW // 2), KW // 2 + 1):
        s = jnp.zeros((NC, HW), jnp.float32)
        for dh in range(-(KH // 2), KH // 2 + 1):
            k = (dh + KH // 2) * KW + (dw + KW // 2)
            s = s + slabs[dh] * w[:, k:k + 1]
        if dw != 0:
            s = pltpu.roll(s, (-dw) % HW, axis=1)
            if dw < 0:
                s = jnp.where(col >= -dw, s, 0.0)     # kill left-edge wrap
            else:
                s = jnp.where(col < W - dw, s, 0.0)   # kill right-edge wrap
        acc = acc + s

    o_ref[...] = (acc + b).astype(o_ref.dtype)


def depthwise_conv2d_bn(x_nchw, weight, gamma, beta, running_mean, running_var,
                        *, padding=1, eps=1e-5):
    """x_nchw: (N, C, H, W); weight: (C, 1, KH, KW) depthwise conv weight."""
    N, C, H, W = x_nchw.shape
    KH, KW = weight.shape[2], weight.shape[3]
    assert weight.shape[0] == C and weight.shape[1] == 1
    assert padding == KH // 2 == KW // 2, "only stride-1 'same' padding supported"

    NC, HW = N * C, H * W

    # Layout-free view of contiguous NCHW: batch*channels on rows, H*W on lanes.
    x_flat = x_nchw.reshape(NC, HW)

    # Fold BN running stats: scale into the weights, bias kept separately; tile
    # per-channel params to the (N*C) folded-row layout.
    scale = gamma / jnp.sqrt(running_var + eps)                         # (C,)
    w_folded = (weight[:, 0].reshape(C, KH * KW)
                * scale[:, None]).astype(jnp.float32)                   # (C, KH*KW)
    bias = (beta - running_mean * scale).reshape(C, 1).astype(jnp.float32)
    w_tiled = jnp.tile(w_folded, (N, 1))                                # (NC, KH*KW)
    b_tiled = jnp.tile(bias, (N, 1))                                    # (NC, 1)

    kernel = functools.partial(_dwconv_bn_kernel, H=H, W=W, KH=KH, KW=KW)

    # Single grid step: at N*C = 8 the whole problem is a few KiB of VMEM and
    # is step/launch-overhead bound, so one step beats any parallel tiling.
    out_flat = pl.pallas_call(
        kernel,
        out_shape=jax.ShapeDtypeStruct((NC, HW), x_nchw.dtype),
        grid=(1,),
        in_specs=[
            pl.BlockSpec((NC, HW), lambda i: (0, 0)),
            pl.BlockSpec((NC, KH * KW), lambda i: (0, 0)),
            pl.BlockSpec((NC, 1), lambda i: (0, 0)),
        ],
        out_specs=pl.BlockSpec((NC, HW), lambda i: (0, 0)),
        compiler_params=pltpu.CompilerParams(
            dimension_semantics=("arbitrary",)),
    )(x_flat, w_tiled, b_tiled)

    return out_flat.reshape(N, C, H, W)


def _reference(x_nchw, weight, gamma, beta, running_mean, running_var,
               *, padding=1, eps=1e-5):
    C = x_nchw.shape[1]
    y = jax.lax.conv_general_dilated(
        x_nchw, weight,
        window_strides=(1, 1),
        padding=((padding, padding), (padding, padding)),
        dimension_numbers=("NCHW", "OIHW", "NCHW"),
        feature_group_count=C,
    )
    scale = gamma / jnp.sqrt(running_var + eps)
    bias = beta - running_mean * scale
    return y * scale[None, :, None, None] + bias[None, :, None, None]


if __name__ == "__main__":
    # Module config: input_channels=output_channels=4, kernel_size=3,
    # groups=input_channels (depthwise), padding=1, stride=1, bias=False.
    N, C, H, W = 2, 4, 16, 16
    KH = KW = 3

    key = jax.random.PRNGKey(0)
    k_x, k_w, k_g, k_b, k_m, k_v = jax.random.split(key, 6)

    x = jax.random.normal(k_x, (N, C, H, W), dtype=jnp.float32)
    weight = jax.random.normal(k_w, (C, 1, KH, KW), dtype=jnp.float32) * 0.1
    gamma = jax.random.normal(k_g, (C,), dtype=jnp.float32) * 0.1 + 1.0
    beta = jax.random.normal(k_b, (C,), dtype=jnp.float32) * 0.1
    running_mean = jax.random.normal(k_m, (C,), dtype=jnp.float32) * 0.1
    running_var = jax.random.uniform(k_v, (C,), dtype=jnp.float32) + 0.5

    out = depthwise_conv2d_bn(x, weight, gamma, beta, running_mean, running_var)
    out = jax.block_until_ready(out)

    ref = _reference(x, weight, gamma, beta, running_mean, running_var)
    assert out.shape == (N, C, H, W)
    assert jnp.allclose(out, ref, atol=1e-5, rtol=1e-5), "mismatch vs reference"

    print("KERNEL_OK")
</pallas_src>

<mosaic_0001>
module attributes {stable_mosaic.version = 11 : i64} {
  func.func @_dwconv_bn_kernel(%arg0: i32, %arg1: memref<8x256xf32, #tpu.memory_space<vmem>>, %arg2: memref<8x9xf32, #tpu.memory_space<vmem>>, %arg3: memref<8x1xf32, #tpu.memory_space<vmem>>, %arg4: memref<8x256xf32, #tpu.memory_space<vmem>>) attributes {dimension_semantics = [#tpu.dimension_semantics<arbitrary>], iteration_bounds = array<i64: 1>, scalar_prefetch = 0 : i64, scratch_operands = 0 : i64, tpu.core_type = #tpu.core_type<tc>, window_params = [{pipeline_mode = #tpu.pipeline_mode<synchronous>, transform_indices = @transform_0, window_bounds = array<i64: 8, 256>}, {pipeline_mode = #tpu.pipeline_mode<synchronous>, transform_indices = @transform_1, window_bounds = array<i64: 8, 9>}, {pipeline_mode = #tpu.pipeline_mode<synchronous>, transform_indices = @transform_2, window_bounds = array<i64: 8, 1>}, {pipeline_mode = #tpu.pipeline_mode<synchronous>, transform_indices = @transform_3, window_bounds = array<i64: 8, 256>}]} {
    %c0 = arith.constant 0 : index
    %c0_0 = arith.constant 0 : index
    %0 = vector.load %arg1[%c0, %c0_0] : memref<8x256xf32, #tpu.memory_space<vmem>>, vector<8x256xf32>
    %c0_1 = arith.constant 0 : index
    %c0_2 = arith.constant 0 : index
    %1 = vector.load %arg2[%c0_1, %c0_2] : memref<8x9xf32, #tpu.memory_space<vmem>>, vector<8x9xf32>
    %c0_3 = arith.constant 0 : index
    %c0_4 = arith.constant 0 : index
    %2 = vector.load %arg3[%c0_3, %c0_4] : memref<8x1xf32, #tpu.memory_space<vmem>>, vector<8x1xf32>
    %3 = tpu.iota {dimensions = array<i32: 1>} : vector<8x256xi32>
    %c15_i32 = arith.constant 15 : i32
    %4 = vector.broadcast %c15_i32 : i32 to vector<8x256xi32>
    %5 = arith.andi %3, %4 : vector<8x256xi32>
    %c4_i32 = arith.constant 4 : i32
    %6 = vector.broadcast %c4_i32 : i32 to vector<8x256xi32>
    %7 = arith.shrsi %3, %6 : vector<8x256xi32>
    %c16_i32 = arith.constant 16 : i32
    %8 = tpu.dynamic_rotate %0 by %c16_i32 dim 1 : vector<8x256xf32>, i32 -> vector<8x256xf32>
    %c1_i32 = arith.constant 1 : i32
    %9 = vector.broadcast %c1_i32 : i32 to vector<8x256xi32>
    %10 = arith.cmpi sge, %7, %9 : vector<8x256xi32>
    %cst = arith.constant 0.000000e+00 : f32
    %11 = vector.broadcast %cst : f32 to vector<8x256xf32>
    %12 = arith.select %10, %8, %11 : vector<8x256xi1>, vector<8x256xf32>
    %c240_i32 = arith.constant 240 : i32
    %13 = tpu.dynamic_rotate %0 by %c240_i32 dim 1 : vector<8x256xf32>, i32 -> vector<8x256xf32>
    %c15_i32_5 = arith.constant 15 : i32
    %14 = vector.broadcast %c15_i32_5 : i32 to vector<8x256xi32>
    %15 = arith.cmpi slt, %7, %14 : vector<8x256xi32>
    %cst_6 = arith.constant 0.000000e+00 : f32
    %16 = vector.broadcast %cst_6 : f32 to vector<8x256xf32>
    %17 = arith.select %15, %13, %16 : vector<8x256xi1>, vector<8x256xf32>
    %cst_7 = arith.constant 0.000000e+00 : f32
    %18 = vector.broadcast %cst_7 : f32 to vector<8x256xf32>
    %cst_8 = arith.constant 0.000000e+00 : f32
    %19 = vector.broadcast %cst_8 : f32 to vector<8x256xf32>
    %20 = vector.extract_strided_slice %1 {offsets = [0, 0], sizes = [8, 1], strides = [1, 1]} : vector<8x9xf32> to vector<8x1xf32>
    %21 = vector.broadcast %20 : vector<8x1xf32> to vector<8x256xf32>
    %22 = arith.mulf %12, %21 : vector<8x256xf32>
    %23 = arith.addf %19, %22 : vector<8x256xf32>
    %24 = vector.extract_strided_slice %1 {offsets = [0, 3], sizes = [8, 1], strides = [1, 1]} : vector<8x9xf32> to vector<8x1xf32>
    %25 = vector.broadcast %24 : vector<8x1xf32> to vector<8x256xf32>
    %26 = arith.mulf %0, %25 : vector<8x256xf32>
    %27 = arith.addf %23, %26 : vector<8x256xf32>
    %28 = vector.extract_strided_slice %1 {offsets = [0, 6], sizes = [8, 1], strides = [1, 1]} : vector<8x9xf32> to vector<8x1xf32>
    %29 = vector.broadcast %28 : vector<8x1xf32> to vector<8x256xf32>
    %30 = arith.mulf %17, %29 : vector<8x256xf32>
    %31 = arith.addf %27, %30 : vector<8x256xf32>
    %c1_i32_9 = arith.constant 1 : i32
    %32 = tpu.dynamic_rotate %31 by %c1_i32_9 dim 1 : vector<8x256xf32>, i32 -> vector<8x256xf32>
    %c1_i32_10 = arith.constant 1 : i32
    %33 = vector.broadcast %c1_i32_10 : i32 to vector<8x256xi32>
    %34 = arith.cmpi sge, %5, %33 : vector<8x256xi32>
    %cst_11 = arith.constant 0.000000e+00 : f32
    %35 = vector.broadcast %cst_11 : f32 to vector<8x256xf32>
    %36 = arith.select %34, %32, %35 : vector<8x256xi1>, vector<8x256xf32>
    %37 = arith.addf %18, %36 : vector<8x256xf32>
    %cst_12 = arith.constant 0.000000e+00 : f32
    %38 = vector.broadcast %cst_12 : f32 to vector<8x256xf32>
    %39 = vector.extract_strided_slice %1 {offsets = [0, 1], sizes = [8, 1], strides = [1, 1]} : vector<8x9xf32> to vector<8x1xf32>
    %40 = vector.broadcast %39 : vector<8x1xf32> to vector<8x256xf32>
    %41 = arith.mulf %12, %40 : vector<8x256xf32>
    %42 = arith.addf %38, %41 : vector<8x256xf32>
    %43 = vector.extract_strided_slice %1 {offsets = [0, 4], sizes = [8, 1], strides = [1, 1]} : vector<8x9xf32> to vector<8x1xf32>
    %44 = vector.broadcast %43 : vector<8x1xf32> to vector<8x256xf32>
    %45 = arith.mulf %0, %44 : vector<8x256xf32>
    %46 = arith.addf %42, %45 : vector<8x256xf32>
    %47 = vector.extract_strided_slice %1 {offsets = [0, 7], sizes = [8, 1], strides = [1, 1]} : vector<8x9xf32> to vector<8x1xf32>
    %48 = vector.broadcast %47 : vector<8x1xf32> to vector<8x256xf32>
    %49 = arith.mulf %17, %48 : vector<8x256xf32>
    %50 = arith.addf %46, %49 : vector<8x256xf32>
    %51 = arith.addf %37, %50 : vector<8x256xf32>
    %cst_13 = arith.constant 0.000000e+00 : f32
    %52 = vector.broadcast %cst_13 : f32 to vector<8x256xf32>
    %53 = vector.extract_strided_slice %1 {offsets = [0, 2], sizes = [8, 1], strides = [1, 1]} : vector<8x9xf32> to vector<8x1xf32>
    %54 = vector.broadcast %53 : vector<8x1xf32> to vector<8x256xf32>
    %55 = arith.mulf %12, %54 : vector<8x256xf32>
    %56 = arith.addf %52, %55 : vector<8x256xf32>
    %57 = vector.extract_strided_slice %1 {offsets = [0, 5], sizes = [8, 1], strides = [1, 1]} : vector<8x9xf32> to vector<8x1xf32>
    %58 = vector.broadcast %57 : vector<8x1xf32> to vector<8x256xf32>
    %59 = arith.mulf %0, %58 : vector<8x256xf32>
    %60 = arith.addf %56, %59 : vector<8x256xf32>
    %61 = vector.extract_strided_slice %1 {offsets = [0, 8], sizes = [8, 1], strides = [1, 1]} : vector<8x9xf32> to vector<8x1xf32>
    %62 = vector.broadcast %61 : vector<8x1xf32> to vector<8x256xf32>
    %63 = arith.mulf %17, %62 : vector<8x256xf32>
    %64 = arith.addf %60, %63 : vector<8x256xf32>
    %c255_i32 = arith.constant 255 : i32
    %65 = tpu.dynamic_rotate %64 by %c255_i32 dim 1 : vector<8x256xf32>, i32 -> vector<8x256xf32>
    %c15_i32_14 = arith.constant 15 : i32
    %66 = vector.broadcast %c15_i32_14 : i32 to vector<8x256xi32>
    %67 = arith.cmpi slt, %5, %66 : vector<8x256xi32>
    %cst_15 = arith.constant 0.000000e+00 : f32
    %68 = vector.broadcast %cst_15 : f32 to vector<8x256xf32>
    %69 = arith.select %67, %65, %68 : vector<8x256xi1>, vector<8x256xf32>
    %70 = arith.addf %51, %69 : vector<8x256xf32>
    %71 = vector.broadcast %2 : vector<8x1xf32> to vector<8x256xf32>
    %72 = arith.addf %70, %71 : vector<8x256xf32>
    %c0_16 = arith.constant 0 : index
    %c0_17 = arith.constant 0 : index
    %73 = vector.load %arg4[%c0_16, %c0_17] : memref<8x256xf32, #tpu.memory_space<vmem>>, vector<8x256xf32>
    tpu.vector_store %arg4[%c0_16, %c0_17], %72 {strides = array<i32>} : memref<8x256xf32, #tpu.memory_space<vmem>>, vector<8x256xf32>,
    return
  }
  func.func @transform_0(%arg0: i32) -> (i32, i32) {
    %c0_i32 = arith.constant 0 : i32
    %c0_i32_0 = arith.constant 0 : i32
    %c0_i32_1 = arith.constant 0 : i32
    return %c0_i32, %c0_i32_0 : i32, i32
  }
  func.func @transform_1(%arg0: i32) -> (i32, i32) {
    %c0_i32 = arith.constant 0 : i32
    %c0_i32_0 = arith.constant 0 : i32
    %c0_i32_1 = arith.constant 0 : i32
    return %c0_i32, %c0_i32_0 : i32, i32
  }
  func.func @transform_2(%arg0: i32) -> (i32, i32) {
    %c0_i32 = arith.constant 0 : i32
    %c0_i32_0 = arith.constant 0 : i32
    %c0_i32_1 = arith.constant 0 : i32
    return %c0_i32, %c0_i32_0 : i32, i32
  }
  func.func @transform_3(%arg0: i32) -> (i32, i32) {
    %c0_i32 = arith.constant 0 : i32
    %c0_i32_0 = arith.constant 0 : i32
    %c0_i32_1 = arith.constant 0 : i32
    return %c0_i32, %c0_i32_0 : i32, i32
  }
}

</mosaic_0001>

<bundles_post_ra>
// kernel: tpu_custom_call.1
= control target key start
LH: loop header
LB: loop body
LE: loop exit
PB: predicated region body
PF: predicated region fallthrough
CT: control target
= control target key end

     0   :  { %8 = vsyncpa [#allocation3], 0  ;;  %s350_s0 = inlined_call_operand.hbm [shape: f32[8,256], index: 0, kind: input, shape index: {}]   ;;  %s351_s1 = inlined_call_operand.vmem [shape: f32[8,9], index: 1, kind: input, shape index: {}]   ;;  %s352_s2 = inlined_call_operand.vmem [shape: f32[8,1], index: 2, kind: input, shape index: {}]   ;;  %s353_s3 = inlined_call_operand.hbm [shape: f32[8,256], index: 3, kind: output, shape index: {}]  }
   0x1   :  { %9 = vsyncpa [#allocation4], 0  ;;  %s258_s12 = smov [#allocation2]   ;;  %s210_s16 = scalar_lea.hbm %s350_s0, 256 }
   0x2   :  { %s16_s13 = sshll.u32 %s258_s12, 4  ;;  %p211_p0 = scmp.ne.s32.totalorder %s350_s0, %s210_s16  ;;  %s17_s13 = int_to_ptr.vmem [resolvable:$true] %s16_s13 }
   0x3   :  { %p214_p1 = scmp.lt.u32.totalorder %s210_s16, %s350_s0 }
   0x5   :  { %p216_p2 = pnand %p214_p1, %p211_p0 }
   0x7   :  { %219 = shalt.err (!%p216_p2)
}
   0x8   :  { %s220_s21 = scalar_lea.vmem %s17_s13, 256  ;;  %p225_p4 = scmp.lt.s32.totalorder %s17_s13, %s17_s13 }
   0x9   :  { %p221_p3 = scmp.ne.s32.totalorder %s17_s13, %s220_s21  ;;  %p226_p5 = scmp.lt.s32.totalorder %s220_s21, %s220_s21 }
   0xb   :  { %p227_p6 = por %p226_p5, %p225_p4 }
   0xd   :  { %p228_p7 = pnand %p227_p6, %p221_p3 }
   0xf   :  { %231 = shalt.err (!%p228_p7)
}
  0x10   :  { %19 = dma.hbm_to_vmem [thread:$0]  %s350_s0, 256, %s17_s13, [#allocation3]  }
  0x11   :  { %254 = dma.done.wait [#allocation3], 256  }
  0x12   :  { %255 = vsyncadd [#allocation3], 4294967040  ;;  %v259_v0 = vmov 6   ;;  %v260_v1 = vmov 0   ;;  %v29_v2 = vld [vmem:[%s351_s1] sm:$0xff]  ;;  %v261_v3 = vmov 2   ;;  %v31_v14 = vlaneseq }
  0x13   :  { %202 = vset.pattern.permute.xlu1 %v259_v0  ;;  %200 = vset.pattern.permute.xlu0 %v260_v1  ;;  %v262_v4 = vmov 3   ;;  %v263_v5 = vmov 5   ;;  %v264_v6 = vmov 8   ;;  %v308_v7 = vld [vmem:[#allocation2] sm:$0xff]  ;;  %s265_s0 = smov 16   ;;  %s266_s1 = smov 112  }
  0x14   :  { %78 = vperm.xlu1 %202, %v29_v2   ;;  %62 = vperm.xlu0 %200, %v29_v2   ;;  %v312_v8 = vld [vmem:[#allocation2 + $0x8] sm:$0xff]  ;;  %v267_v9 = vmov 1   ;;  %v268_v10 = vmov 4   ;;  %v30_v11 = vld [vmem:[%s352_s2] sm:$0xff]  ;;  %v269_v12 = vmov 7   ;;  %v319_v17 = vand.u32 127, %v31_v14 }
  0x15   :  { %s270_s2 = smov 127   ;;  %s271_s28 = smov 1  }
  0x16   :  { %v322_v20 = vadd.s32 128, %v319_v17  ;;  %v36_v21 = vshra.s32 %v319_v17, 4  ;;  %vm42_vm0 = vcmp.lt.s32.totalorder %v319_v17, 16  ;;  %vm53_vm3 = vcmp.lt.s32.totalorder %v319_v17, 112  ;;  %s272_s29 = smov [#allocation5]  }
  0x17   :  { %vm89_vm6 = vcmp.lt.s32.totalorder %v319_v17, 1  ;;  %vm152_vm9 = vcmp.lt.s32.totalorder %v319_v17, 127  ;;  %s176_s30 = sshll.u32 %s272_s29, 4  ;;  %s177_s30 = int_to_ptr.vmem [resolvable:$true] %s176_s30 }
  0x18   :  { %203 = vset.pattern.permute.xlu1 %v261_v3  ;;  %201 = vset.pattern.permute.xlu0 %v262_v4  ;;  %v37_v23 = vshra.s32 %v322_v20, 4  ;;  %vm45_vm1 = vcmp.ge.s32.totalorder %v36_v21, 1  ;;  %vm56_vm4 = vcmp.lt.s32.totalorder %v36_v21, 15  ;;  %s232_s4 = scalar_lea.vmem %s177_s30, 256  ;;  %p237_p9 = scmp.lt.s32.totalorder %s177_s30, %s177_s30 }
  0x19   :  { %125 = vperm.xlu1 %203, %v29_v2   ;;  %70 = vperm.xlu0 %201, %v29_v2   ;;  %p233_p8 = scmp.ne.s32.totalorder %s177_s30, %s232_s4  ;;  %p238_p10 = scmp.lt.s32.totalorder %s232_s4, %s232_s4 }
  0x1a   :  { %vm46_vm2 = vcmp.ge.s32.totalorder %v37_v23, 1  ;;  %vm57_vm5 = vcmp.lt.s32.totalorder %v37_v23, 15 }
  0x1b   :  { %p239_p11 = por %p238_p10, %p237_p9 }
  0x1d   :  { %204 = vset.pattern.permute.xlu1 %v263_v5  ;;  %205 = vset.pattern.permute.xlu0 %v264_v6  ;;  %v34_v5 = vand.u32 15, %v319_v17  ;;  %v35_v6 = vand.u32 15, %v322_v20  ;;  %p240_p12 = pnand %p239_p11, %p233_p8 }
  0x1e   :  { %133 = vperm.xlu1 %204, %v29_v2   ;;  %141 = vperm.xlu0 %205, %v29_v2  }
  0x1f   :  { %vm92_vm7 = vcmp.ge.s32.totalorder %v34_v5, 1  ;;  %vm93_vm8 = vcmp.ge.s32.totalorder %v35_v6, 1  ;;  %vm155_vm10 = vcmp.lt.s32.totalorder %v34_v5, 15  ;;  %vm156_vm11 = vcmp.lt.s32.totalorder %v35_v6, 15 }
  0x22   :  { %38 = vrot.lane.b32.xlu1 %v308_v7, %s265_s0  ;;  %49 = vrot.lane.b32.xlu0 %v308_v7, %s266_s1 }
  0x23   :  { %206 = vset.pattern.permute.xlu0 %v267_v9  ;;  %207 = vset.pattern.permute.xlu1 %v268_v10 }
  0x26   :  { %40 = vrot.lane.b32.xlu1 %v312_v8, %s265_s0  ;;  %99 = vperm.xlu0 %206, %v29_v2  }
  0x2a   :  { %51 = vrot.lane.b32.xlu1 %v312_v8, %s266_s1  ;;  %209 = vset.pattern.permute.xlu0 %v260_v1 }
  0x2b   :  { %163 = vperm.xlu0 %209, %v30_v11  }
  0x2e   :  { %107 = vperm.xlu1 %207, %v29_v2  }
  0x32   :  { %208 = vset.pattern.permute.xlu1 %v269_v12 }
  0x33   :  { %115 = vperm.xlu1 %208, %v29_v2  }
  0x93   :  { %v79_v13 = vpop.permute.xlu1 %78  ;;  %v63_v15 = vpop.permute.xlu0 %62 }
  0x98   :  { %v126_v16 = vpop.permute.xlu1 %125  ;;  %v71_v18 = vpop.permute.xlu0 %70 }
  0x99   :  { %v73_v34 = vmul.f32 %v71_v18, %v308_v7  ;;  %v74_v46 = vmul.f32 %v71_v18, %v312_v8 }
  0x9d   :  { %v134_v19 = vpop.permute.xlu1 %133  ;;  %v142_v24 = vpop.permute.xlu0 %141 }
  0x9e   :  { %v136_v35 = vmul.f32 %v134_v19, %v308_v7  ;;  %v137_v57 = vmul.f32 %v134_v19, %v312_v8 }
  0xa1   :  { %v39_v22 = vpop.permute.xlu1 %38  ;;  %v50_v29 = vpop.permute.xlu0 %49 }
  0xa5   :  { %v41_v25 = vpop.permute.xlu1 %40  ;;  %v100_v47 = vpop.permute.xlu0 %99 }
  0xa6   :  { %v43_v26 = vsel %vm42_vm0, %v39_v22, %v41_v25  ;;  %v44_v27 = vsel %vm42_vm0, %v41_v25, %v39_v22 }
  0xa7   :  { %v47_v28 = vsel %vm45_vm1, %v44_v27, 0.0  ;;  %v48_v30 = vsel %vm46_vm2, %v43_v26, 0.0 }
  0xa8   :  { %v65_v31 = vmul.f32 %v63_v15, %v47_v28  ;;  %v128_v32 = vmul.f32 %v126_v16, %v47_v28  ;;  %v66_v38 = vmul.f32 %v63_v15, %v48_v30  ;;  %v129_v53 = vmul.f32 %v126_v16, %v48_v30 }
  0xa9   :  { %v52_v33 = vpop.permute.xlu1 %51  ;;  %v102_v55 = vmul.f32 %v100_v47, %v47_v28  ;;  %v103_v56 = vmul.f32 %v100_v47, %v48_v30 }
  0xaa   :  { %v54_v36 = vsel %vm53_vm3, %v50_v29, %v52_v33  ;;  %v55_v37 = vsel %vm53_vm3, %v52_v33, %v50_v29  ;;  %v138_v43 = vadd.f32 %v136_v35, %v128_v32  ;;  %v75_v44 = vadd.f32 %v73_v34, %v65_v31  ;;  %v164_v9 = vpop.permute.xlu0 %163 }
  0xab   :  { %v58_v39 = vsel %vm56_vm4, %v54_v36, 0.0  ;;  %v59_v40 = vsel %vm57_vm5, %v55_v37, 0.0  ;;  %v76_v54 = vadd.f32 %v74_v46, %v66_v38  ;;  %v139_v1 = vadd.f32 %v137_v57, %v129_v53 }
  0xac   :  { %v81_v41 = vmul.f32 %v79_v13, %v58_v39  ;;  %v144_v42 = vmul.f32 %v142_v24, %v58_v39  ;;  %v82_v48 = vmul.f32 %v79_v13, %v59_v40  ;;  %v145_v58 = vmul.f32 %v142_v24, %v59_v40 }
  0xad   :  { %v108_v45 = vpop.permute.xlu1 %107 }
  0xae   :  { %v146_v49 = vadd.f32 %v144_v42, %v138_v43  ;;  %v83_v50 = vadd.f32 %v81_v41, %v75_v44  ;;  %v110_v51 = vmul.f32 %v108_v45, %v308_v7  ;;  %v111_v52 = vmul.f32 %v108_v45, %v312_v8 }
  0xaf   :  { %v84_v60 = vadd.f32 %v82_v48, %v76_v54  ;;  %v147_v4 = vadd.f32 %v145_v58, %v139_v1 }
  0xb0   :  { %148 = vrot.lane.b32.xlu0 %v146_v49, %s270_s2  ;;  %85 = vrot.lane.b32.xlu1 %v83_v50, %s271_s28  ;;  %v112_v61 = vadd.f32 %v110_v51, %v102_v55  ;;  %v113_v62 = vadd.f32 %v111_v52, %v103_v56 }
  0xb2   :  { %v116_v59 = vpop.permute.xlu1 %115 }
  0xb3   :  { %v118_v63 = vmul.f32 %v116_v59, %v58_v39  ;;  %v119_v0 = vmul.f32 %v116_v59, %v59_v40 }
  0xb4   :  { %87 = vrot.lane.b32.xlu1 %v84_v60, %s271_s28 }
  0xb5   :  { %v120_v2 = vadd.f32 %v118_v63, %v112_v61  ;;  %v121_v3 = vadd.f32 %v119_v0, %v113_v62 }
  0xb8   :  { %150 = vrot.lane.b32.xlu1 %v147_v4, %s270_s2 }
 0x122   :  { %v86_v7 = vpop.permute.xlu1 %85  ;;  %v149_v14 = vpop.permute.xlu0 %148 }
 0x126   :  { %v88_v8 = vpop.permute.xlu1 %87 }
 0x127   :  { %v90_v10 = vsel %vm89_vm6, %v86_v7, %v88_v8  ;;  %v91_v11 = vsel %vm89_vm6, %v88_v8, %v86_v7 }
 0x128   :  { %v94_v12 = vsel %vm92_vm7, %v91_v11, 0.0  ;;  %v95_v13 = vsel %vm93_vm8, %v90_v10, 0.0 }
 0x129   :  { %v122_v16 = vadd.f32 %v120_v2, %v94_v12  ;;  %v123_v18 = vadd.f32 %v121_v3, %v95_v13 }
 0x12a   :  { %v151_v15 = vpop.permute.xlu1 %150 }
 0x12b   :  { %v153_v19 = vsel %vm152_vm9, %v149_v14, %v151_v15  ;;  %v154_v20 = vsel %vm152_vm9, %v151_v15, %v149_v14 }
 0x12c   :  { %v157_v21 = vsel %vm155_vm10, %v153_v19, 0.0  ;;  %v158_v22 = vsel %vm156_vm11, %v154_v20, 0.0 }
 0x12d   :  { %v159_v23 = vadd.f32 %v157_v21, %v122_v16  ;;  %v160_v24 = vadd.f32 %v158_v22, %v123_v18 }
 0x12f   :  { %v166_v25 = vadd.f32 %v164_v9, %v159_v23  ;;  %v167_v26 = vadd.f32 %v164_v9, %v160_v24 }
 0x131   :  { %168 = vst [vmem:[#allocation5] sm:$0xff] %v166_v25  ;;  %169 = vst [vmem:[#allocation5 + $0x8] sm:$0xff] %v167_v26 }
 0x132   :  { %243 = shalt.err (!%p240_p12)
}
 0x133   :  { %s244_s7 = scalar_lea.hbm %s353_s3, 256 }
 0x134   :  { %p245_p13 = scmp.ne.s32.totalorder %s353_s3, %s244_s7  ;;  %p248_p0 = scmp.lt.u32.totalorder %s244_s7, %s353_s3 }
 0x136   :  { %p250_p1 = pnand %p248_p0, %p245_p13 }
 0x138   :  { %253 = shalt.err (!%p250_p1)
}
 0x139   :  { %179 = dma.vmem_to_hbm [thread:$0]  %s177_s30, 256, %s353_s3, [#allocation4]  }
 0x13a   :  { %256 = dma.done.wait [#allocation4], 256  }
 0x13b   :  { %257 = vsyncadd [#allocation4], 4294967040 }
 0x13c   :  { %183 = vsyncpa [#allocation3], 1 }
 0x13d   :  { %184 = vsyncpa [#allocation4], 1 }

</bundles_post_ra>
